<compile_context>
chip_gen: v5e
topology: v5e:2x2
jax: 0.10.0
libtpu: 0.0.40
codegen_flags: <defaults>
</compile_context>

<pallas_src>
import math
from functools import partial

import jax
import jax.numpy as jnp
from jax import lax
from jax.experimental import pallas as pl
from jax.experimental.pallas import tpu as pltpu

_HALO = 128        # lane-granular halo block width (min legal block width)
_MIN_TBLK = 256    # floor for the auto-shrunk time tile


def _round_up(x, m):
    return ((x + m - 1) // m) * m


def _round_down(x, m):
    return (x // m) * m


def _vmem_capacity_bytes():
    try:
        info = pltpu.get_tpu_info()
        cap = int(getattr(info, "vmem_capacity_bytes", 0) or 0)
        if cap > 0:
            return cap
    except Exception:
        pass
    return 64 * 1024 * 1024  # conservative default (v7x per-core VMEM)


def _compiler_params(est_bytes, dims, cap):
    limit = min(int(0.9 * cap), max(32 * 1024 * 1024, int(1.3 * est_bytes)))
    return pltpu.CompilerParams(dimension_semantics=dims,
                                vmem_limit_bytes=int(limit))


# ----------------------------------------------------------------------------
# Kernel bodies
# ----------------------------------------------------------------------------

def _pointwise_kernel(x_ref, w_ref, b_ref, o_ref, *, compute_dtype):
    # kernel_size == 1, padding == 0: a plain (C_out, C_in) @ (C_in, tb) matmul.
    x = x_ref[...]
    if x.dtype != compute_dtype:
        x = x.astype(compute_dtype)
    acc = jnp.dot(w_ref[...], x, preferred_element_type=jnp.float32)
    o_ref[...] = (acc + b_ref[...]).astype(o_ref.dtype)


def _single_tile_kernel(x_ref, w_ref, b_ref, o_ref, xe_ref, *,
                        K, pad, T, out_len, compute_dtype):
    # Whole time axis in one tile.  xe_ref: (C_in, T + 2*pad) zero-padded copy.
    c_in = xe_ref.shape[0]
    if pad > 0:
        zpad = jnp.zeros((c_in, pad), xe_ref.dtype)
        xe_ref[:, :pad] = zpad
        xe_ref[:, pad + T:] = zpad
    x = x_ref[...]
    if x.dtype != compute_dtype:
        x = x.astype(compute_dtype)
    xe_ref[:, pad:pad + T] = x
    acc = jnp.dot(w_ref[0], xe_ref[:, 0:out_len],
                  preferred_element_type=jnp.float32)
    for k in range(1, K):
        acc = acc + jnp.dot(w_ref[k], xe_ref[:, k:k + out_len],
                            preferred_element_type=jnp.float32)
    o_ref[...] = (acc + b_ref[...]).astype(o_ref.dtype)


def _tiled_kernel(xl_ref, x_ref, xr_ref, w_ref, b_ref, o_ref, xe_ref, *,
                  K, pad, T, tb, compute_dtype):
    # xl_ref: (C_in, 128)  columns [base-128, base)      of the original signal
    # x_ref : (C_in, tb)   columns [base, base+tb)
    # xr_ref: (C_in, 128)  columns [base+tb, base+tb+128)
    # w_ref : (K, C_out, C_in)   tap matrices (resident)
    # b_ref : (C_out, 1) f32     bias (resident)
    # xe_ref: (C_in, 128 + tb + 128) VMEM staging scratch (compute dtype)
    cd = compute_dtype
    c_in = x_ref.shape[0]
    base = pl.program_id(1) * tb

    lane_h = lax.broadcasted_iota(jnp.int32, (1, _HALO), 1)
    lane_m = lax.broadcasted_iota(jnp.int32, (1, tb), 1)

    def cast(v):
        return v if v.dtype == cd else v.astype(cd)

    zero_h = jnp.zeros((c_in, _HALO), cd)
    zero_m = jnp.zeros((c_in, tb), cd)

    # Conv zero-padding done in VMEM: mask columns outside [0, T).
    gl = base - _HALO + lane_h
    xe_ref[:, :_HALO] = jnp.where((gl >= 0) & (gl < T), cast(xl_ref[...]), zero_h)
    gm = base + lane_m
    xe_ref[:, _HALO:_HALO + tb] = jnp.where(gm < T, cast(x_ref[...]), zero_m)
    gr = base + tb + lane_h
    xe_ref[:, _HALO + tb:] = jnp.where(gr < T, cast(xr_ref[...]), zero_h)

    # K accumulating MXU dots over lane-shifted slices of the staging scratch.
    off = _HALO - pad
    acc = jnp.dot(w_ref[0], xe_ref[:, off:off + tb],
                  preferred_element_type=jnp.float32)
    for k in range(1, K):
        acc = acc + jnp.dot(w_ref[k], xe_ref[:, off + k:off + k + tb],
                            preferred_element_type=jnp.float32)
    o_ref[...] = (acc + b_ref[...]).astype(o_ref.dtype)


# ----------------------------------------------------------------------------
# Wrapper
# ----------------------------------------------------------------------------

def conv_norm_forward(signal, weight, bias=None, *, stride=1, dilation=1,
                      padding=None, t_block=1024, compute_dtype=None):
    """ConvNorm.forward (Conv1d) for stride=1, dilation=1.

    signal: (B, C_in, T); weight: (C_out, C_in, K); bias: (C_out,) or None.
    compute_dtype: dtype fed to the MXU (default signal.dtype; pass
      jnp.bfloat16 for the bf16-native MXUs — accumulation stays f32).
    t_block: time tile (rounded up to a multiple of 128); auto-shrunk to the
      device's VMEM budget.
    """
    # TODO(synk): stride > 1 / dilation > 1 ConvNorm configs are not implemented.
    assert stride == 1 and dilation == 1
    B, C_in, T = signal.shape
    C_out, C_in_w, K = weight.shape
    assert C_in_w == C_in
    if padding is None:
        assert K % 2 == 1
        padding = (K - 1) // 2
    pad = int(padding)
    out_len = T + 2 * pad - (K - 1)
    assert out_len > 0

    cd = jnp.dtype(compute_dtype) if compute_dtype is not None else signal.dtype
    out_dtype = signal.dtype

    if bias is None:
        bias = jnp.zeros((C_out,), jnp.float32)
    bias2d = bias.astype(jnp.float32).reshape(C_out, 1)
    # (C_out, C_in, K) -> (K, C_out, C_in): w_taps[k] is the k-th tap matrix.
    w_taps = jnp.transpose(weight, (2, 0, 1)).astype(cd)

    t_block = max(128, _round_up(int(t_block), 128))
    cap = _vmem_capacity_bytes()
    csz = jnp.dtype(cd).itemsize
    isz = jnp.dtype(signal.dtype).itemsize
    osz = jnp.dtype(out_dtype).itemsize

    cost = pl.CostEstimate(
        flops=2 * B * C_out * C_in * K * out_len,
        transcendentals=0,
        bytes_accessed=(B * C_in * T * isz + K * C_out * C_in * csz
                        + B * C_out * out_len * osz + C_out * 4))

    def run(single_buf):
        def resident(shape, imap):
            # Constant-index resident operands: single-buffer them when possible.
            if single_buf:
                return pl.BlockSpec(shape, imap, pipeline_mode=pl.Buffered(1))
            return pl.BlockSpec(shape, imap)

        wbufs = 1 if single_buf else 2

        # ---- Pointwise conv (K == 1, padding == 0): plain tiled matmul. ----
        if K == 1 and pad == 0:
            tb = out_len if out_len <= t_block else t_block
            num_t = pl.cdiv(out_len, tb)
            w2d = w_taps.reshape(C_out, C_in)
            est = (2 * C_in * tb * isz + 2 * C_out * tb * osz
                   + wbufs * C_out * C_in * csz
                   + C_out * tb * 4 + C_in * tb * csz)
            return pl.pallas_call(
                partial(_pointwise_kernel, compute_dtype=cd),
                out_shape=jax.ShapeDtypeStruct((B, C_out, out_len), out_dtype),
                grid_spec=pltpu.PrefetchScalarGridSpec(
                    num_scalar_prefetch=0,
                    grid=(B, num_t),
                    in_specs=[
                        pl.BlockSpec((None, C_in, tb), lambda b, t: (b, 0, t)),
                        resident((C_out, C_in), lambda b, t: (0, 0)),
                        resident((C_out, 1), lambda b, t: (0, 0)),
                    ],
                    out_specs=pl.BlockSpec((None, C_out, tb),
                                           lambda b, t: (b, 0, t)),
                ),
                compiler_params=_compiler_params(
                    est, ("parallel", "parallel"), cap),
                cost_estimate=cost,
            )(signal, w2d, bias2d)

        # ---- Single-tile path: whole time axis fits one block. ----
        if out_len <= t_block:
            est = (2 * C_in * T * isz + 2 * C_out * out_len * osz
                   + wbufs * K * C_out * C_in * csz
                   + C_in * (T + 2 * pad) * csz
                   + C_out * out_len * 4 + C_in * out_len * csz)
            return pl.pallas_call(
                partial(_single_tile_kernel, K=K, pad=pad, T=T,
                        out_len=out_len, compute_dtype=cd),
                out_shape=jax.ShapeDtypeStruct((B, C_out, out_len), out_dtype),
                grid_spec=pltpu.PrefetchScalarGridSpec(
                    num_scalar_prefetch=0,
                    grid=(B,),
                    in_specs=[
                        pl.BlockSpec((None, C_in, T), lambda b: (b, 0, 0)),
                        resident((K, C_out, C_in), lambda b: (0, 0, 0)),
                        resident((C_out, 1), lambda b: (0, 0)),
                    ],
                    out_specs=pl.BlockSpec((None, C_out, out_len),
                                           lambda b: (b, 0, 0)),
                    scratch_shapes=[pltpu.VMEM((C_in, T + 2 * pad), cd)],
                ),
                compiler_params=_compiler_params(est, ("parallel",), cap),
                cost_estimate=cost,
            )(signal, w_taps, bias2d)

        # ---- Multi-tile path: (left halo | main | right halo) per step. ----
        assert pad <= _HALO and (K - 1 - pad) <= _HALO, \
            "kernel/padding too large for the 128-lane halo scheme"

        def est_fn(tb_):
            return int(1.25 * (
                2 * C_in * tb_ * isz + 4 * C_in * _HALO * isz
                + wbufs * K * C_out * C_in * csz
                + 2 * C_out * tb_ * osz
                + C_in * (tb_ + 2 * _HALO) * csz
                + C_out * tb_ * 4 + C_in * tb_ * csz)) + (1 << 20)

        tb = t_block
        while tb > _MIN_TBLK and est_fn(tb) > int(0.7 * cap):
            tb = max(_MIN_TBLK, _round_down(tb // 2, 128))

        assert T >= tb, \
            "signal shorter than the time tile (unsupported padding config)"
        num_t = pl.cdiv(out_len, tb)      # last output block may be partial
        t_mult = tb // _HALO
        n_tb = pl.cdiv(T, tb)
        n_h = pl.cdiv(T, _HALO)

        return pl.pallas_call(
            partial(_tiled_kernel, K=K, pad=pad, T=T, tb=tb, compute_dtype=cd),
            out_shape=jax.ShapeDtypeStruct((B, C_out, out_len), out_dtype),
            grid_spec=pltpu.PrefetchScalarGridSpec(
                num_scalar_prefetch=0,
                grid=(B, num_t),
                in_specs=[
                    # left halo: 128 columns just before this tile (clamped;
                    # out-of-range columns are zero-masked in the kernel)
                    pl.BlockSpec((None, C_in, _HALO),
                                 lambda b, t: (b, 0,
                                               jnp.clip(t * t_mult - 1, 0, n_h - 1))),
                    # main tile (possibly partial at the end; masked in-kernel)
                    pl.BlockSpec((None, C_in, tb),
                                 lambda b, t: (b, 0, jnp.minimum(t, n_tb - 1))),
                    # right halo: first 128 columns of the next tile
                    pl.BlockSpec((None, C_in, _HALO),
                                 lambda b, t: (b, 0,
                                               jnp.minimum((t + 1) * t_mult, n_h - 1))),
                    resident((K, C_out, C_in), lambda b, t: (0, 0, 0)),
                    resident((C_out, 1), lambda b, t: (0, 0)),
                ],
                out_specs=pl.BlockSpec((None, C_out, tb), lambda b, t: (b, 0, t)),
                scratch_shapes=[pltpu.VMEM((C_in, tb + 2 * _HALO), cd)],
            ),
            compiler_params=_compiler_params(
                est_fn(tb), ("parallel", "parallel"), cap),
            cost_estimate=cost,
        )(signal, signal, signal, w_taps, bias2d)

    try:
        return run(True)
    except Exception:
        # Fallback if single-buffered resident operands (pl.Buffered(1)) are
        # not supported by this JAX/Mosaic version.
        return run(False)


# ----------------------------------------------------------------------------
# Reference / tests
# ----------------------------------------------------------------------------

def xavier_uniform(key, shape, gain=1.0):
    # torch.nn.init.xavier_uniform_ for Conv1d weight (C_out, C_in, K).
    c_out, c_in, k = shape
    fan_in, fan_out = c_in * k, c_out * k
    bound = gain * math.sqrt(6.0 / (fan_in + fan_out))
    return jax.random.uniform(key, shape, jnp.float32, -bound, bound)


def reference_conv1d(signal, weight, bias, padding):
    out = jax.lax.conv_general_dilated(
        signal, weight, window_strides=(1,), padding=[(padding, padding)],
        dimension_numbers=("NCH", "OIH", "NCH"),
        precision=jax.lax.Precision.HIGHEST)
    return out + bias.reshape(1, -1, 1)


if __name__ == "__main__":
    key = jax.random.PRNGKey(0)

    # Case 1: small ConvNorm config (K=3), single-tile path, f32.
    k_x, k_w, k_b = jax.random.split(jax.random.fold_in(key, 0), 3)
    B, C_in, C_out, T, K = 2, 4, 8, 16, 3
    signal = jax.random.normal(k_x, (B, C_in, T), jnp.float32)
    weight = xavier_uniform(k_w, (C_out, C_in, K), gain=1.0)  # gain('linear')=1
    bb = 1.0 / math.sqrt(C_in * K)
    bias = jax.random.uniform(k_b, (C_out,), jnp.float32, -bb, bb)
    out = jax.block_until_ready(conv_norm_forward(signal, weight, bias))
    ref = reference_conv1d(signal, weight, bias, (K - 1) // 2)
    assert out.shape == ref.shape
    assert jnp.allclose(out, ref, atol=1e-5, rtol=1e-5), "case1 mismatch"

    # Case 2: multi-tile path with halos + non-divisible tail (T=300, tb=128).
    k_x, k_w, k_b = jax.random.split(jax.random.fold_in(key, 1), 3)
    B, C_in, C_out, T, K = 2, 16, 24, 300, 5
    signal = jax.random.normal(k_x, (B, C_in, T), jnp.float32)
    weight = xavier_uniform(k_w, (C_out, C_in, K), gain=1.0)
    bb = 1.0 / math.sqrt(C_in * K)
    bias = jax.random.uniform(k_b, (C_out,), jnp.float32, -bb, bb)
    out = jax.block_until_ready(
        conv_norm_forward(signal, weight, bias, t_block=128))
    ref = reference_conv1d(signal, weight, bias, (K - 1) // 2)
    assert out.shape == ref.shape
    assert jnp.allclose(out, ref, atol=1e-4, rtol=1e-4), "case2 mismatch"

    # Case 3: bf16 MXU path (f32 accumulation), loose tolerance vs f32 reference.
    out_bf16 = jax.block_until_ready(
        conv_norm_forward(signal, weight, bias, t_block=128,
                          compute_dtype=jnp.bfloat16))
    assert jnp.allclose(out_bf16, ref, atol=7e-2, rtol=7e-2), "case3 mismatch"

    # Case 4: pointwise conv (kernel_size=1) fast path.
    k_x, k_w, _ = jax.random.split(jax.random.fold_in(key, 2), 3)
    B, C_in, C_out, T, K = 2, 8, 16, 64, 1
    signal = jax.random.normal(k_x, (B, C_in, T), jnp.float32)
    weight = xavier_uniform(k_w, (C_out, C_in, K), gain=1.0)
    bias = jnp.zeros((C_out,), jnp.float32)
    out = jax.block_until_ready(conv_norm_forward(signal, weight, bias))
    ref = reference_conv1d(signal, weight, bias, 0)
    assert out.shape == ref.shape
    assert jnp.allclose(out, ref, atol=1e-5, rtol=1e-5), "case4 mismatch"

    # Case 5: default t_block=1024, long signal with partial tail (T=2300, K=5).
    k_x, k_w, k_b = jax.random.split(jax.random.fold_in(key, 3), 3)
    B, C_in, C_out, T, K = 2, 32, 48, 2300, 5
    signal = jax.random.normal(k_x, (B, C_in, T), jnp.float32)
    weight = xavier_uniform(k_w, (C_out, C_in, K), gain=1.0)
    bb = 1.0 / math.sqrt(C_in * K)
    bias = jax.random.uniform(k_b, (C_out,), jnp.float32, -bb, bb)
    out = jax.block_until_ready(conv_norm_forward(signal, weight, bias))
    ref = reference_conv1d(signal, weight, bias, (K - 1) // 2)
    assert out.shape == ref.shape
    assert jnp.allclose(out, ref, atol=1e-3, rtol=1e-3), "case5 mismatch"

    print("KERNEL_OK")
</pallas_src>

<mosaic_0001>
module attributes {stable_mosaic.version = 11 : i64} {
  func.func @_single_tile_kernel(%arg0: i32, %arg1: memref<1x4x16xf32, #tpu.memory_space<vmem>>, %arg2: memref<3x8x4xf32, #tpu.memory_space<vmem>>, %arg3: memref<8x1xf32, #tpu.memory_space<vmem>>, %arg4: memref<1x8x16xf32, #tpu.memory_space<vmem>>, %arg5: memref<4x18xf32, #tpu.memory_space<vmem>>) attributes {dimension_semantics = [#tpu.dimension_semantics<parallel>], iteration_bounds = array<i64: 2>, scalar_prefetch = 0 : i64, scratch_operands = 1 : i64, tpu.core_type = #tpu.core_type<tc>, window_params = [{transform_indices = @transform_0, window_bounds = array<i64: 1, 4, 16>}, {pipeline_mode = #tpu.pipeline_mode<synchronous>, transform_indices = @transform_1, window_bounds = array<i64: 3, 8, 4>}, {pipeline_mode = #tpu.pipeline_mode<synchronous>, transform_indices = @transform_2, window_bounds = array<i64: 8, 1>}, {transform_indices = @transform_3, window_bounds = array<i64: 1, 8, 16>}]} {
    %cst = arith.constant 0.000000e+00 : f32
    %0 = vector.broadcast %cst : f32 to vector<4x1xf32>
    %c0 = arith.constant 0 : index
    %c0_0 = arith.constant 0 : index
    %1 = vector.load %arg5[%c0, %c0_0] : memref<4x18xf32, #tpu.memory_space<vmem>>, vector<4x1xf32>
    tpu.vector_store %arg5[%c0, %c0_0], %0 {strides = array<i32>} : memref<4x18xf32, #tpu.memory_space<vmem>>, vector<4x1xf32>,
    %c0_1 = arith.constant 0 : index
    %c17 = arith.constant 17 : index
    %2 = vector.load %arg5[%c0_1, %c17] : memref<4x18xf32, #tpu.memory_space<vmem>>, vector<4x1xf32>
    tpu.vector_store %arg5[%c0_1, %c17], %0 {strides = array<i32>} : memref<4x18xf32, #tpu.memory_space<vmem>>, vector<4x1xf32>,
    %c0_2 = arith.constant 0 : index
    %c0_3 = arith.constant 0 : index
    %c0_4 = arith.constant 0 : index
    %3 = vector.load %arg1[%c0_2, %c0_3, %c0_4] : memref<1x4x16xf32, #tpu.memory_space<vmem>>, vector<1x4x16xf32>
    %4 = vector.shape_cast %3 : vector<1x4x16xf32> to vector<4x16xf32>
    %c0_5 = arith.constant 0 : index
    %c1 = arith.constant 1 : index
    %5 = vector.load %arg5[%c0_5, %c1] : memref<4x18xf32, #tpu.memory_space<vmem>>, vector<4x16xf32>
    tpu.vector_store %arg5[%c0_5, %c1], %4 {strides = array<i32>} : memref<4x18xf32, #tpu.memory_space<vmem>>, vector<4x16xf32>,
    %c0_6 = arith.constant 0 : index
    %c0_7 = arith.constant 0 : index
    %c0_8 = arith.constant 0 : index
    %6 = vector.load %arg2[%c0_6, %c0_7, %c0_8] : memref<3x8x4xf32, #tpu.memory_space<vmem>>, vector<1x8x4xf32>
    %7 = vector.shape_cast %6 : vector<1x8x4xf32> to vector<8x4xf32>
    %c0_9 = arith.constant 0 : index
    %c0_10 = arith.constant 0 : index
    %8 = vector.load %arg5[%c0_9, %c0_10] : memref<4x18xf32, #tpu.memory_space<vmem>>, vector<4x16xf32>
    %cst_11 = arith.constant dense<0.000000e+00> : vector<8x16xf32>
    %9 = tpu.matmul %7, %8, %cst_11 {dimension_numbers = #tpu.dot_dimension_numbers<[1], [0], [0], [1], [0, 0, 1, 1], [], []>} : vector<8x4xf32>, vector<4x16xf32>, vector<8x16xf32> -> vector<8x16xf32>
    %c1_12 = arith.constant 1 : index
    %c0_13 = arith.constant 0 : index
    %c0_14 = arith.constant 0 : index
    %10 = vector.load %arg2[%c1_12, %c0_13, %c0_14] : memref<3x8x4xf32, #tpu.memory_space<vmem>>, vector<1x8x4xf32>
    %11 = vector.shape_cast %10 : vector<1x8x4xf32> to vector<8x4xf32>
    %c0_15 = arith.constant 0 : index
    %c1_16 = arith.constant 1 : index
    %12 = vector.load %arg5[%c0_15, %c1_16] : memref<4x18xf32, #tpu.memory_space<vmem>>, vector<4x16xf32>
    %cst_17 = arith.constant dense<0.000000e+00> : vector<8x16xf32>
    %13 = tpu.matmul %11, %12, %cst_17 {dimension_numbers = #tpu.dot_dimension_numbers<[1], [0], [0], [1], [0, 0, 1, 1], [], []>} : vector<8x4xf32>, vector<4x16xf32>, vector<8x16xf32> -> vector<8x16xf32>
    %14 = arith.addf %9, %13 : vector<8x16xf32>
    %c2 = arith.constant 2 : index
    %c0_18 = arith.constant 0 : index
    %c0_19 = arith.constant 0 : index
    %15 = vector.load %arg2[%c2, %c0_18, %c0_19] : memref<3x8x4xf32, #tpu.memory_space<vmem>>, vector<1x8x4xf32>
    %16 = vector.shape_cast %15 : vector<1x8x4xf32> to vector<8x4xf32>
    %c0_20 = arith.constant 0 : index
    %c2_21 = arith.constant 2 : index
    %17 = vector.load %arg5[%c0_20, %c2_21] : memref<4x18xf32, #tpu.memory_space<vmem>>, vector<4x16xf32>
    %cst_22 = arith.constant dense<0.000000e+00> : vector<8x16xf32>
    %18 = tpu.matmul %16, %17, %cst_22 {dimension_numbers = #tpu.dot_dimension_numbers<[1], [0], [0], [1], [0, 0, 1, 1], [], []>} : vector<8x4xf32>, vector<4x16xf32>, vector<8x16xf32> -> vector<8x16xf32>
    %19 = arith.addf %14, %18 : vector<8x16xf32>
    %c0_23 = arith.constant 0 : index
    %c0_24 = arith.constant 0 : index
    %20 = vector.load %arg3[%c0_23, %c0_24] : memref<8x1xf32, #tpu.memory_space<vmem>>, vector<8x1xf32>
    %21 = vector.broadcast %20 : vector<8x1xf32> to vector<8x16xf32>
    %22 = arith.addf %19, %21 : vector<8x16xf32>
    %c0_25 = arith.constant 0 : index
    %c0_26 = arith.constant 0 : index
    %c0_27 = arith.constant 0 : index
    %23 = vector.load %arg4[%c0_25, %c0_26, %c0_27] : memref<1x8x16xf32, #tpu.memory_space<vmem>>, vector<1x8x16xf32>
    %24 = vector.shape_cast %23 : vector<1x8x16xf32> to vector<8x16xf32>
    %25 = vector.shape_cast %22 : vector<8x16xf32> to vector<1x8x16xf32>
    tpu.vector_store %arg4[%c0_25, %c0_26, %c0_27], %25 {strides = array<i32>} : memref<1x8x16xf32, #tpu.memory_space<vmem>>, vector<1x8x16xf32>,
    return
  }
  func.func @transform_0(%arg0: i32) -> (i32, i32, i32) {
    %c0_i32 = arith.constant 0 : i32
    %c0_i32_0 = arith.constant 0 : i32
    %c0_i32_1 = arith.constant 0 : i32
    return %arg0, %c0_i32, %c0_i32_0 : i32, i32, i32
  }
  func.func @transform_1(%arg0: i32) -> (i32, i32, i32) {
    %c0_i32 = arith.constant 0 : i32
    %c0_i32_0 = arith.constant 0 : i32
    %c0_i32_1 = arith.constant 0 : i32
    %c0_i32_2 = arith.constant 0 : i32
    return %c0_i32, %c0_i32_0, %c0_i32_1 : i32, i32, i32
  }
  func.func @transform_2(%arg0: i32) -> (i32, i32) {
    %c0_i32 = arith.constant 0 : i32
    %c0_i32_0 = arith.constant 0 : i32
    %c0_i32_1 = arith.constant 0 : i32
    return %c0_i32, %c0_i32_0 : i32, i32
  }
  func.func @transform_3(%arg0: i32) -> (i32, i32, i32) {
    %c0_i32 = arith.constant 0 : i32
    %c0_i32_0 = arith.constant 0 : i32
    %c0_i32_1 = arith.constant 0 : i32
    return %arg0, %c0_i32, %c0_i32_0 : i32, i32, i32
  }
}

module attributes {stable_mosaic.version = 11 : i64} {
  func.func @_single_tile_kernel(%arg0: i32, %arg1: memref<1x4x16xf32, #tpu.memory_space<vmem>>, %arg2: memref<3x8x4xf32, #tpu.memory_space<vmem>>, %arg3: memref<8x1xf32, #tpu.memory_space<vmem>>, %arg4: memref<1x8x16xf32, #tpu.memory_space<vmem>>, %arg5: memref<4x18xf32, #tpu.memory_space<vmem>>) attributes {dimension_semantics = [#tpu.dimension_semantics<parallel>], iteration_bounds = array<i64: 2>, scalar_prefetch = 0 : i64, scratch_operands = 1 : i64, tpu.core_type = #tpu.core_type<tc>, window_params = [{transform_indices = @transform_0, window_bounds = array<i64: 1, 4, 16>}, {pipeline_mode = #tpu.pipeline_mode<synchronous>, transform_indices = @transform_1, window_bounds = array<i64: 3, 8, 4>}, {pipeline_mode = #tpu.pipeline_mode<synchronous>, transform_indices = @transform_2, window_bounds = array<i64: 8, 1>}, {transform_indices = @transform_3, window_bounds = array<i64: 1, 8, 16>}]} {
    %cst = arith.constant 0.000000e+00 : f32
    %0 = vector.broadcast %cst : f32 to vector<4x1xf32>
    %c0 = arith.constant 0 : index
    %c0_0 = arith.constant 0 : index
    %1 = vector.load %arg5[%c0, %c0_0] : memref<4x18xf32, #tpu.memory_space<vmem>>, vector<4x1xf32>
    tpu.vector_store %arg5[%c0, %c0_0], %0 {strides = array<i32>} : memref<4x18xf32, #tpu.memory_space<vmem>>, vector<4x1xf32>,
    %c0_1 = arith.constant 0 : index
    %c17 = arith.constant 17 : index
    %2 = vector.load %arg5[%c0_1, %c17] : memref<4x18xf32, #tpu.memory_space<vmem>>, vector<4x1xf32>
    tpu.vector_store %arg5[%c0_1, %c17], %0 {strides = array<i32>} : memref<4x18xf32, #tpu.memory_space<vmem>>, vector<4x1xf32>,
    %c0_2 = arith.constant 0 : index
    %c0_3 = arith.constant 0 : index
    %c0_4 = arith.constant 0 : index
    %3 = vector.load %arg1[%c0_2, %c0_3, %c0_4] : memref<1x4x16xf32, #tpu.memory_space<vmem>>, vector<1x4x16xf32>
    %4 = vector.shape_cast %3 : vector<1x4x16xf32> to vector<4x16xf32>
    %c0_5 = arith.constant 0 : index
    %c1 = arith.constant 1 : index
    %5 = vector.load %arg5[%c0_5, %c1] : memref<4x18xf32, #tpu.memory_space<vmem>>, vector<4x16xf32>
    tpu.vector_store %arg5[%c0_5, %c1], %4 {strides = array<i32>} : memref<4x18xf32, #tpu.memory_space<vmem>>, vector<4x16xf32>,
    %c0_6 = arith.constant 0 : index
    %c0_7 = arith.constant 0 : index
    %c0_8 = arith.constant 0 : index
    %6 = vector.load %arg2[%c0_6, %c0_7, %c0_8] : memref<3x8x4xf32, #tpu.memory_space<vmem>>, vector<1x8x4xf32>
    %7 = vector.shape_cast %6 : vector<1x8x4xf32> to vector<8x4xf32>
    %c0_9 = arith.constant 0 : index
    %c0_10 = arith.constant 0 : index
    %8 = vector.load %arg5[%c0_9, %c0_10] : memref<4x18xf32, #tpu.memory_space<vmem>>, vector<4x16xf32>
    %cst_11 = arith.constant dense<0.000000e+00> : vector<8x16xf32>
    %9 = tpu.matmul %7, %8, %cst_11 {dimension_numbers = #tpu.dot_dimension_numbers<[1], [0], [0], [1], [0, 0, 1, 1], [], []>} : vector<8x4xf32>, vector<4x16xf32>, vector<8x16xf32> -> vector<8x16xf32>
    %c1_12 = arith.constant 1 : index
    %c0_13 = arith.constant 0 : index
    %c0_14 = arith.constant 0 : index
    %10 = vector.load %arg2[%c1_12, %c0_13, %c0_14] : memref<3x8x4xf32, #tpu.memory_space<vmem>>, vector<1x8x4xf32>
    %11 = vector.shape_cast %10 : vector<1x8x4xf32> to vector<8x4xf32>
    %c0_15 = arith.constant 0 : index
    %c1_16 = arith.constant 1 : index
    %12 = vector.load %arg5[%c0_15, %c1_16] : memref<4x18xf32, #tpu.memory_space<vmem>>, vector<4x16xf32>
    %cst_17 = arith.constant dense<0.000000e+00> : vector<8x16xf32>
    %13 = tpu.matmul %11, %12, %cst_17 {dimension_numbers = #tpu.dot_dimension_numbers<[1], [0], [0], [1], [0, 0, 1, 1], [], []>} : vector<8x4xf32>, vector<4x16xf32>, vector<8x16xf32> -> vector<8x16xf32>
    %14 = arith.addf %9, %13 : vector<8x16xf32>
    %c2 = arith.constant 2 : index
    %c0_18 = arith.constant 0 : index
    %c0_19 = arith.constant 0 : index
    %15 = vector.load %arg2[%c2, %c0_18, %c0_19] : memref<3x8x4xf32, #tpu.memory_space<vmem>>, vector<1x8x4xf32>
    %16 = vector.shape_cast %15 : vector<1x8x4xf32> to vector<8x4xf32>
    %c0_20 = arith.constant 0 : index
    %c2_21 = arith.constant 2 : index
    %17 = vector.load %arg5[%c0_20, %c2_21] : memref<4x18xf32, #tpu.memory_space<vmem>>, vector<4x16xf32>
    %cst_22 = arith.constant dense<0.000000e+00> : vector<8x16xf32>
    %18 = tpu.matmul %16, %17, %cst_22 {dimension_numbers = #tpu.dot_dimension_numbers<[1], [0], [0], [1], [0, 0, 1, 1], [], []>} : vector<8x4xf32>, vector<4x16xf32>, vector<8x16xf32> -> vector<8x16xf32>
    %19 = arith.addf %14, %18 : vector<8x16xf32>
    %c0_23 = arith.constant 0 : index
    %c0_24 = arith.constant 0 : index
    %20 = vector.load %arg3[%c0_23, %c0_24] : memref<8x1xf32, #tpu.memory_space<vmem>>, vector<8x1xf32>
    %21 = vector.broadcast %20 : vector<8x1xf32> to vector<8x16xf32>
    %22 = arith.addf %19, %21 : vector<8x16xf32>
    %c0_25 = arith.constant 0 : index
    %c0_26 = arith.constant 0 : index
    %c0_27 = arith.constant 0 : index
    %23 = vector.load %arg4[%c0_25, %c0_26, %c0_27] : memref<1x8x16xf32, #tpu.memory_space<vmem>>, vector<1x8x16xf32>
    %24 = vector.shape_cast %23 : vector<1x8x16xf32> to vector<8x16xf32>
    %25 = vector.shape_cast %22 : vector<8x16xf32> to vector<1x8x16xf32>
    tpu.vector_store %arg4[%c0_25, %c0_26, %c0_27], %25 {strides = array<i32>} : memref<1x8x16xf32, #tpu.memory_space<vmem>>, vector<1x8x16xf32>,
    return
  }
  func.func @transform_0(%arg0: i32) -> (i32, i32, i32) {
    %c0_i32 = arith.constant 0 : i32
    %c0_i32_0 = arith.constant 0 : i32
    %c0_i32_1 = arith.constant 0 : i32
    return %arg0, %c0_i32, %c0_i32_0 : i32, i32, i32
  }
  func.func @transform_1(%arg0: i32) -> (i32, i32, i32) {
    %c0_i32 = arith.constant 0 : i32
    %c0_i32_0 = arith.constant 0 : i32
    %c0_i32_1 = arith.constant 0 : i32
    %c0_i32_2 = arith.constant 0 : i32
    return %c0_i32, %c0_i32_0, %c0_i32_1 : i32, i32, i32
  }
  func.func @transform_2(%arg0: i32) -> (i32, i32) {
    %c0_i32 = arith.constant 0 : i32
    %c0_i32_0 = arith.constant 0 : i32
    %c0_i32_1 = arith.constant 0 : i32
    return %c0_i32, %c0_i32_0 : i32, i32
  }
  func.func @transform_3(%arg0: i32) -> (i32, i32, i32) {
    %c0_i32 = arith.constant 0 : i32
    %c0_i32_0 = arith.constant 0 : i32
    %c0_i32_1 = arith.constant 0 : i32
    return %arg0, %c0_i32, %c0_i32_0 : i32, i32, i32
  }
}

</mosaic_0001>

<bundles_post_ra>
// kernel: tpu_custom_call.1
= control target key start
LH: loop header
LB: loop body
LE: loop exit
PB: predicated region body
PF: predicated region fallthrough
CT: control target
= control target key end

     0   :  { %8 = vsyncpa [#allocation4], 0  ;;  %s603_s0 = inlined_call_operand.vmem [shape: f32[2,4,16], index: 0, kind: input, shape index: {}]   ;;  %s604_s1 = inlined_call_operand.vmem [shape: f32[3,8,4], index: 1, kind: input, shape index: {}]   ;;  %s605_s2 = inlined_call_operand.vmem [shape: f32[8,1], index: 2, kind: input, shape index: {}]   ;;  %s606_s3 = inlined_call_operand.hbm [shape: f32[2,8,16], index: 3, kind: output, shape index: {}]  }
   0x1   :  { %10 = vsyncpa [#allocation4 + $0x1], 0  ;;  %s503_s12 = smov 0   ;;  %s505_s13 = smov 0  }
   0x2   :  { %s507_s14 = smov 0   ;;  %s509_s15 = smov 0  }
   0x3 LB: > { %s524_s16 = sadd.s32 4294967295, %s476_s15   ;;  %s350_s17 = sadd.s32 4294967294, %s476_s15   ;;  %s476_s15 = sphi %s509_s15, %s612_s15   ;;  %s472_s14 = sphi %s507_s14, %s611_s14   ;;  %s468_s13 = sphi %s505_s13, %s610_s13   ;;  %s464_s12 = sphi %s503_s12, %s609_s12  }
   0x4   : > { %s528_s18 = sadd.s32 1, %s476_s15   ;;  %s91_s19 = sadd.s32 1, %s472_s14 }
   0x5   : > { %s88_s20 = ssub.s32 %s476_s15, %s528_s18  ;;  %p101_p0 = scmp.ne.s32.totalorder %s472_s14, %s468_s13 }
   0x6   : > { %p89_p1 = scmp.eq.s32.totalorder %s88_s20, 0  ;;  %p102_p2 = scmp.eq.s32.totalorder %s524_s16, 1 }
   0x7   : > { %p107_p3 = scmp.ne.s32.totalorder %s468_s13, %s464_s12  ;;  %p108_p4 = scmp.eq.s32.totalorder %s350_s17, 1 }
   0x8   : > { %s539_s21 = scalar_select %p89_p1, %s472_s14, %s91_s19  }
   0x9   : > { %p541_p5 = por %p102_p2, %p101_p0  ;;  %p545_p6 = por %p108_p4, %p107_p3 }
   0xa   : > { %p353_p7 = scmp.ge.s32.totalorder %s476_s15, 1  ;;  %p139_p8 = scmp.lt.s32.totalorder %s476_s15, 3 }
   0xc   : > { %p140_p9 = pnand %p353_p7, %p139_p8 }
   0xd   : > { %p162_p10 = scmp.lt.s32.totalorder (!%p140_p9), %s524_s16, 1  ;;  %s479_s29 = smov (!%p140_p9), 1  }
   0xe   : > { %143 = sbr.rel (%p140_p9) target bundleno = 402 (0x192), region = 32  ;;  %s480_s30 = smov (!%p140_p9), 127  }
   0xf   : > { %s481_s4 = smov (!%p140_p9), 126   ;;  %s159_s19 = sand.u32 (!%p140_p9), 1, %s468_s13  }
  0x10   : > { %s354_s20 = sshll.u32 (!%p140_p9), %s159_s19, 3  ;;  %s434_s8 = scalar_lea.hbm (!%p140_p9), %s606_s3, 16 }
  0x13   : > { %vm166_vm0 = vcmask 3072   ;;  %vm168_vm1 = vcmask 142472   ;;  %v478_v0 = vmov 0.0   ;;  %s163_s24 = scalar_select %p162_p10, %s524_s16, 1  ;;  %vm175_vm2 = vcmask 134152   ;;  %v177_v4 = vld [vmem:[%s604_s1] sm:$0xff] }
  0x14   : > { %167 = vst.msk [vmem:[#allocation2] sm:$0xf] %vm166_vm0, %v478_v0  ;;  %vm188_vm3 = vcmask 1043456   ;;  %vm184_vm4 = vcmask 31744   ;;  %v266_v5 = vld [vmem:[%s605_s2] sm:$0xff]  ;;  %v482_v6 = vmov 0  }
  0x15   : > { %169 = vst.msk [vmem:[#allocation2] sm:$0xf] %vm168_vm1, %v478_v0  ;;  %s355_s25 = sshll.u32 %s163_s24, 2  ;;  %412 = vset.pattern.permute.xlu1 %v482_v6  ;;  %413 = vset.pattern.permute.xlu0 %v482_v6  ;;  %v361_v7 = vld [vmem:[%s604_s1 + $0x10] sm:$0xff]  ;;  %v356_v8 = vld [vmem:[%s604_s1 + $0x8] sm:$0xff]  ;;  %s365_s24 = sshll.u32 %s524_s16, 3 }
  0x16   : > { %s165_s28 = scalar_lea.vmem %s603_s0, %s355_s25  ;;  %s286_s27 = scalar_lea.hbm %s606_s3, %s365_s24  ;;  %vm273_vm5 = vcmask 130048  }
  0x17   : > { %v170_v1 = vld [vmem:[%s165_s28] sm:$0xf]  ;;  %s161_s28 = scalar_lea.vmem [#allocation3], %s354_s20 }
  0x18   : > { %172 = vrot.lane.b32.xlu0 %v170_v1, %s479_s29  ;;  %s288_s29 = sshll.u32 %s161_s28, 4  ;;  %s289_s29 = int_to_ptr.vmem [resolvable:$true] %s288_s29 }
  0x8a   : > { %v173_v2 = vpop.permute.xlu0 %172 }
  0x8b   : > { %176 = vst.msk [vmem:[#allocation2] sm:$0xf] %vm175_vm2, %v173_v2 }
  0x92   : > { %v178_v3 = vld [vmem:[#allocation2] sm:$0xf] }
  0x93   : > { %182 = vrot.lane.b32.xlu1 %v178_v3, %s480_s30  ;;  %238 = vrot.lane.b32.xlu0 %v178_v3, %s481_s4  ;;  %s290_s30 = sshll.u32 %s286_s27, 4  ;;  %s276_s4 = scalar_lea.sflag [#allocation4], %s159_s19  ;;  %s291_s30 = int_to_ptr.hbm [resolvable:$true] %s290_s30 }
  0x94   : > { %359 = vmatpush.msk.msra.mxu1 %vm188_vm3, %v178_v3  ;;  %s428_s5 = sshra.s32 %s291_s30, 4  ;;  %s429_s5 = int_to_ptr.hbm [resolvable:$true] %s428_s5 }
  0x95   : > { %360 = vmatmul.msk.f32.vlgmr.msra.gmra.mxu1 %vm184_vm4, %v177_v4  ;;  %s430_s16 = scalar_lea.hbm %s429_s5, 8  ;;  %p435_p0 = scmp.lt.s32.totalorder %s429_s5, %s606_s3 }
  0x96   : > { %p431_p11 = scmp.ne.s32.totalorder %s429_s5, %s430_s16  ;;  %p436_p1 = scmp.lt.s32.totalorder %s434_s8, %s430_s16 }
  0x98   : > { %p432_p12 = pnand %p431_p11, %p541_p5  ;;  %p437_p2 = por %p436_p1, %p435_p0 }
  0x9a   : > { %p433_p13 = pneg %p432_p12 }
  0x9b   : > { %269 = vperm.xlu1 %412, %v266_v5  }
  0x9c   : > { %p438_p3 = pnand %p437_p2, %p433_p13 }
 0x105   : > { %v183_v9 = vpop.permute.xlu1 %182  ;;  %v239_v10 = vpop.permute.xlu0 %238 }
 0x106   : > { %357 = vmatpush.msk.msra.mxu0 %vm188_vm3, %v183_v9  ;;  %362 = vmatpush.msk.msra.mxu2 %vm188_vm3, %v239_v10 }
 0x107   : > { %363 = vmatmul.msk.f32.vlgmr.msra.gmra.mxu2 %vm184_vm4, %v361_v7  ;;  %358 = vmatmul.msk.f32.vlgmr.msra.gmra.mxu0 %vm184_vm4, %v356_v8 }
 0x10d   : > { %v270_v15 = vpop.permute.xlu1 %269 }
 0x112   : > { %v233_v12 = vpop.f32.mrf.mxu1 }
 0x184   : > { %v208_v11 = vpop.f32.mrf.mxu0 }
 0x185   : > { %v234_v13 = vadd.f32 %v233_v12, %v208_v11 }
 0x18a   : > { %v262_v14 = vpop.f32.mrf.mxu2 }
 0x18b   : > { %v265_v16 = vadd.f32 %v262_v14, %v234_v13 }
 0x18d   : > { %v272_v17 = vadd.f32 %v270_v15, %v265_v16 }
 0x18f   : > { %274 = vst.msk [vmem:[%s161_s28] sm:$0xff] %vm273_vm5, %v272_v17 }
 0x190   : > { %441 = shalt.err (!%p438_p3)
}
 0x191   : > { %368 = dma.vmem_to_hbm [thread:$0]  (%p541_p5), %s289_s29, 128, %s291_s30, %s276_s4  }
 0x192 PF: > { %p374_p4 = scmp.ge.s32.totalorder %s476_s15, 2  ;;  %s302_s11 = sand.u32 1, %s464_s12  }
 0x193   : > { %s303_s17 = scalar_lea.sflag [#allocation4], %s302_s11 }
 0x194   : > { %p371_p7 = pnand %p374_p4, %p545_p6 }
 0x196   : > { %p372_p8 = pneg %p371_p7 }
 0x198   : > { %459 = dma.done.wait (%p372_p8), %s303_s17, 128  }
 0x199   : > { %461 = vsyncadd (%p372_p8), %s303_s17, 4294967168  ;;  %p13_p9 = scmp.ge.s32.totalorder %s528_s18, 4   ;;  %s609_s12 = smov %s468_s13 }
 0x19a   : > { %s610_s13 = smov %s472_s14  ;;  %s611_s14 = smov %s539_s21 }
 0x19b   : > { %s612_s15 = smov %s528_s18  ;;  %15 = sbr.rel (!%p13_p9) target bundleno = 3 (0x3), region = 69 }
 0x1a0   :  { %309 = vsyncpa [#allocation4], 1 }
 0x1a1   :  { %311 = vsyncpa [#allocation4 + $0x1], 1 }

// kernel: tpu_custom_call.1
= control target key start
LH: loop header
LB: loop body
LE: loop exit
PB: predicated region body
PF: predicated region fallthrough
CT: control target
= control target key end

     0   :  { %8 = vsyncpa [#allocation4], 0  ;;  %s603_s0 = inlined_call_operand.vmem [shape: f32[2,4,16], index: 0, kind: input, shape index: {}]   ;;  %s604_s1 = inlined_call_operand.vmem [shape: f32[3,8,4], index: 1, kind: input, shape index: {}]   ;;  %s605_s2 = inlined_call_operand.vmem [shape: f32[8,1], index: 2, kind: input, shape index: {}]   ;;  %s606_s3 = inlined_call_operand.hbm [shape: f32[2,8,16], index: 3, kind: output, shape index: {}]  }
   0x1   :  { %10 = vsyncpa [#allocation4 + $0x1], 0  ;;  %s503_s12 = smov 0   ;;  %s505_s13 = smov 0  }
   0x2   :  { %s507_s14 = smov 0   ;;  %s509_s15 = smov 0  }
   0x3 LB: > { %s524_s16 = sadd.s32 4294967295, %s476_s15   ;;  %s350_s17 = sadd.s32 4294967294, %s476_s15   ;;  %s476_s15 = sphi %s509_s15, %s612_s15   ;;  %s472_s14 = sphi %s507_s14, %s611_s14   ;;  %s468_s13 = sphi %s505_s13, %s610_s13   ;;  %s464_s12 = sphi %s503_s12, %s609_s12  }
   0x4   : > { %s528_s18 = sadd.s32 1, %s476_s15   ;;  %s91_s19 = sadd.s32 1, %s472_s14 }
   0x5   : > { %s88_s20 = ssub.s32 %s476_s15, %s528_s18  ;;  %p101_p0 = scmp.ne.s32.totalorder %s472_s14, %s468_s13 }
   0x6   : > { %p89_p1 = scmp.eq.s32.totalorder %s88_s20, 0  ;;  %p102_p2 = scmp.eq.s32.totalorder %s524_s16, 1 }
   0x7   : > { %p107_p3 = scmp.ne.s32.totalorder %s468_s13, %s464_s12  ;;  %p108_p4 = scmp.eq.s32.totalorder %s350_s17, 1 }
   0x8   : > { %s539_s21 = scalar_select %p89_p1, %s472_s14, %s91_s19  }
   0x9   : > { %p541_p5 = por %p102_p2, %p101_p0  ;;  %p545_p6 = por %p108_p4, %p107_p3 }
   0xa   : > { %p353_p7 = scmp.ge.s32.totalorder %s476_s15, 1  ;;  %p139_p8 = scmp.lt.s32.totalorder %s476_s15, 3 }
   0xc   : > { %p140_p9 = pnand %p353_p7, %p139_p8 }
   0xd   : > { %p162_p10 = scmp.lt.s32.totalorder (!%p140_p9), %s524_s16, 1  ;;  %s479_s29 = smov (!%p140_p9), 1  }
   0xe   : > { %143 = sbr.rel (%p140_p9) target bundleno = 402 (0x192), region = 32  ;;  %s480_s30 = smov (!%p140_p9), 127  }
   0xf   : > { %s481_s4 = smov (!%p140_p9), 126   ;;  %s159_s19 = sand.u32 (!%p140_p9), 1, %s468_s13  }
  0x10   : > { %s354_s20 = sshll.u32 (!%p140_p9), %s159_s19, 3  ;;  %s434_s8 = scalar_lea.hbm (!%p140_p9), %s606_s3, 16 }
  0x13   : > { %vm166_vm0 = vcmask 3072   ;;  %vm168_vm1 = vcmask 142472   ;;  %v478_v0 = vmov 0.0   ;;  %s163_s24 = scalar_select %p162_p10, %s524_s16, 1  ;;  %vm175_vm2 = vcmask 134152   ;;  %v177_v4 = vld [vmem:[%s604_s1] sm:$0xff] }
  0x14   : > { %167 = vst.msk [vmem:[#allocation2] sm:$0xf] %vm166_vm0, %v478_v0  ;;  %vm188_vm3 = vcmask 1043456   ;;  %vm184_vm4 = vcmask 31744   ;;  %v266_v5 = vld [vmem:[%s605_s2] sm:$0xff]  ;;  %v482_v6 = vmov 0  }
  0x15   : > { %169 = vst.msk [vmem:[#allocation2] sm:$0xf] %vm168_vm1, %v478_v0  ;;  %s355_s25 = sshll.u32 %s163_s24, 2  ;;  %412 = vset.pattern.permute.xlu1 %v482_v6  ;;  %413 = vset.pattern.permute.xlu0 %v482_v6  ;;  %v361_v7 = vld [vmem:[%s604_s1 + $0x10] sm:$0xff]  ;;  %v356_v8 = vld [vmem:[%s604_s1 + $0x8] sm:$0xff]  ;;  %s365_s24 = sshll.u32 %s524_s16, 3 }
  0x16   : > { %s165_s28 = scalar_lea.vmem %s603_s0, %s355_s25  ;;  %s286_s27 = scalar_lea.hbm %s606_s3, %s365_s24  ;;  %vm273_vm5 = vcmask 130048  }
  0x17   : > { %v170_v1 = vld [vmem:[%s165_s28] sm:$0xf]  ;;  %s161_s28 = scalar_lea.vmem [#allocation3], %s354_s20 }
  0x18   : > { %172 = vrot.lane.b32.xlu0 %v170_v1, %s479_s29  ;;  %s288_s29 = sshll.u32 %s161_s28, 4  ;;  %s289_s29 = int_to_ptr.vmem [resolvable:$true] %s288_s29 }
  0x8a   : > { %v173_v2 = vpop.permute.xlu0 %172 }
  0x8b   : > { %176 = vst.msk [vmem:[#allocation2] sm:$0xf] %vm175_vm2, %v173_v2 }
  0x92   : > { %v178_v3 = vld [vmem:[#allocation2] sm:$0xf] }
  0x93   : > { %182 = vrot.lane.b32.xlu1 %v178_v3, %s480_s30  ;;  %238 = vrot.lane.b32.xlu0 %v178_v3, %s481_s4  ;;  %s290_s30 = sshll.u32 %s286_s27, 4  ;;  %s276_s4 = scalar_lea.sflag [#allocation4], %s159_s19  ;;  %s291_s30 = int_to_ptr.hbm [resolvable:$true] %s290_s30 }
  0x94   : > { %359 = vmatpush.msk.msra.mxu1 %vm188_vm3, %v178_v3  ;;  %s428_s5 = sshra.s32 %s291_s30, 4  ;;  %s429_s5 = int_to_ptr.hbm [resolvable:$true] %s428_s5 }
  0x95   : > { %360 = vmatmul.msk.f32.vlgmr.msra.gmra.mxu1 %vm184_vm4, %v177_v4  ;;  %s430_s16 = scalar_lea.hbm %s429_s5, 8  ;;  %p435_p0 = scmp.lt.s32.totalorder %s429_s5, %s606_s3 }
  0x96   : > { %p431_p11 = scmp.ne.s32.totalorder %s429_s5, %s430_s16  ;;  %p436_p1 = scmp.lt.s32.totalorder %s434_s8, %s430_s16 }
  0x98   : > { %p432_p12 = pnand %p431_p11, %p541_p5  ;;  %p437_p2 = por %p436_p1, %p435_p0 }
  0x9a   : > { %p433_p13 = pneg %p432_p12 }
  0x9b   : > { %269 = vperm.xlu1 %412, %v266_v5  }
  0x9c   : > { %p438_p3 = pnand %p437_p2, %p433_p13 }
 0x105   : > { %v183_v9 = vpop.permute.xlu1 %182  ;;  %v239_v10 = vpop.permute.xlu0 %238 }
 0x106   : > { %357 = vmatpush.msk.msra.mxu0 %vm188_vm3, %v183_v9  ;;  %362 = vmatpush.msk.msra.mxu2 %vm188_vm3, %v239_v10 }
 0x107   : > { %363 = vmatmul.msk.f32.vlgmr.msra.gmra.mxu2 %vm184_vm4, %v361_v7  ;;  %358 = vmatmul.msk.f32.vlgmr.msra.gmra.mxu0 %vm184_vm4, %v356_v8 }
 0x10d   : > { %v270_v15 = vpop.permute.xlu1 %269 }
 0x112   : > { %v233_v12 = vpop.f32.mrf.mxu1 }
 0x184   : > { %v208_v11 = vpop.f32.mrf.mxu0 }
 0x185   : > { %v234_v13 = vadd.f32 %v233_v12, %v208_v11 }
 0x18a   : > { %v262_v14 = vpop.f32.mrf.mxu2 }
 0x18b   : > { %v265_v16 = vadd.f32 %v262_v14, %v234_v13 }
 0x18d   : > { %v272_v17 = vadd.f32 %v270_v15, %v265_v16 }
 0x18f   : > { %274 = vst.msk [vmem:[%s161_s28] sm:$0xff] %vm273_vm5, %v272_v17 }
 0x190   : > { %441 = shalt.err (!%p438_p3)
}
 0x191   : > { %368 = dma.vmem_to_hbm [thread:$0]  (%p541_p5), %s289_s29, 128, %s291_s30, %s276_s4  }
 0x192 PF: > { %p374_p4 = scmp.ge.s32.totalorder %s476_s15, 2  ;;  %s302_s11 = sand.u32 1, %s464_s12  }
 0x193   : > { %s303_s17 = scalar_lea.sflag [#allocation4], %s302_s11 }
 0x194   : > { %p371_p7 = pnand %p374_p4, %p545_p6 }
 0x196   : > { %p372_p8 = pneg %p371_p7 }
 0x198   : > { %459 = dma.done.wait (%p372_p8), %s303_s17, 128  }
 0x199   : > { %461 = vsyncadd (%p372_p8), %s303_s17, 4294967168  ;;  %p13_p9 = scmp.ge.s32.totalorder %s528_s18, 4   ;;  %s609_s12 = smov %s468_s13 }
 0x19a   : > { %s610_s13 = smov %s472_s14  ;;  %s611_s14 = smov %s539_s21 }
 0x19b   : > { %s612_s15 = smov %s528_s18  ;;  %15 = sbr.rel (!%p13_p9) target bundleno = 3 (0x3), region = 69 }
 0x1a0   :  { %309 = vsyncpa [#allocation4], 1 }
 0x1a1   :  { %311 = vsyncpa [#allocation4 + $0x1], 1 }

</bundles_post_ra>
